<compile_context>
chip_gen: v7x
topology: tpu7x:2x2x1
jax: 0.10.0
libtpu: 0.0.40
codegen_flags: <defaults>
</compile_context>

<pallas_src>
import functools

import jax
import jax.numpy as jnp
from jax import lax
from jax.experimental import pallas as pl
from jax.experimental.pallas import tpu as pltpu


def _round_up(n, m):
    return ((n + m - 1) // m) * m


def _actor_kernel(x_ref, w1_ref, b1_ref, w2_ref, b2_ref, w3_ref, b3_ref, o_ref,
                  *, matmul_dtype):
    # Layer 1: (TB, S) @ (S, H) + (1, H) -> ReLU.  Weights arrive pre-cast to
    # matmul_dtype (hoisted to the wrapper); only the streamed x tile is cast here
    # (a no-op when dtypes already match).  f32 accumulation on the MXU.
    x = x_ref[...].astype(matmul_dtype)
    h1 = jnp.dot(x, w1_ref[...], preferred_element_type=jnp.float32)
    h1 = jnp.maximum(h1 + b1_ref[...], 0.0)
    # TODO(synk): for S<=8 layer 1 could be S broadcast-FMAs on the VPU instead of a
    # K=S MXU pass; left as the MXU form for simplicity.

    # Layer 2: (TB, H) @ (H, H) + (1, H) -> ReLU.
    h2 = jnp.dot(h1.astype(matmul_dtype), w2_ref[...],
                 preferred_element_type=jnp.float32)
    h2 = jnp.maximum(h2 + b2_ref[...], 0.0)

    # Layer 3, lane-dense: contract the hidden axis of (1, H) x (TB, H) -> (1, TB) so
    # the TB results land along lanes and the store/writeback is unmasked & contiguous.
    row = lax.dot_general(w3_ref[...], h2,
                          dimension_numbers=(((1,), (1,)), ((), ())),
                          preferred_element_type=jnp.float32)
    o_ref[...] = (row + b3_ref[0]).astype(o_ref.dtype)


def actor_forward(x, params, *, tile_b=None, matmul_dtype=jnp.float32):
    """Fused Actor forward. x: (B, S). Returns (B, 1) in x.dtype."""
    w1, b1, w2, b2, w3, b3 = params
    B, S = x.shape
    H = w1.shape[1]
    matmul_dtype = jnp.dtype(matmul_dtype)

    # ---- Tiny batches: pad up to one 128-lane tile (a few KiB; keeps every block
    # within the array extent).  Large batches are NEVER padded.
    if B < 128:
        x = jnp.pad(x, ((0, 128 - B), (0, 0)))
        B_pad = 128
    else:
        B_pad = B

    # ---- Batch tile derived from a VMEM budget; multiple of 128 so the lane-dense
    # (1, tile) output block is always layout-legal.
    if tile_b is None:
        bytes_per_row = 2 * (S * x.dtype.itemsize + 4)     # double-buffered x row + out
        tile_b = (8 * 1024 * 1024) // max(bytes_per_row, 1)
    tile_b = max(128, min(int(tile_b), 8192))
    tb = min(_round_up(tile_b, 128), (B_pad // 128) * 128)
    # Keep >= 2 grid steps for big single-tile batches so v7x's two TensorCores can
    # split the "parallel" batch axis (one extra ~0.35us step on v5e/v6e: negligible).
    if pl.cdiv(B_pad, tb) == 1 and B_pad > 2048:
        tb = _round_up(pl.cdiv(B_pad, 2), 128)
    grid = (pl.cdiv(B_pad, tb),)

    # ---- Hoisted casts / reshapes: resident weights are cast ONCE here, never
    # re-cast per grid step inside the kernel.
    w1m = w1.astype(matmul_dtype)
    w2m = w2.astype(matmul_dtype)
    b1r = b1.reshape(1, H).astype(jnp.float32)
    b2r = b2.reshape(1, H).astype(jnp.float32)
    w3_row = w3.reshape(1, H).astype(jnp.float32)      # layer-3 weight as a lane row
    b3s = b3.reshape(1).astype(jnp.float32)            # scalar bias -> 1-D SMEM ref

    # ---- VMEM budget: resident weights (double-buffer head-room) + streamed tiles.
    resident = (S * H + H * H) * matmul_dtype.itemsize + (3 * H) * 4
    streamed = 2 * (tb * S * x.dtype.itemsize + tb * 4)
    vmem_limit = int(min(max(2 * resident + streamed + (2 << 20), 32 * 1024 * 1024),
                         127 * 1024 * 1024))

    kernel = functools.partial(_actor_kernel, matmul_dtype=matmul_dtype)

    out = pl.pallas_call(
        kernel,
        out_shape=jax.ShapeDtypeStruct((1, B_pad), x.dtype),
        grid_spec=pltpu.PrefetchScalarGridSpec(
            num_scalar_prefetch=0,
            grid=grid,
            in_specs=[
                # Activation stream: tiled over batch -> auto double-buffered pipeline.
                pl.BlockSpec((tb, S), lambda i: (i, 0)),
                # Weights / biases: constant index_maps -> DMA'd once, VMEM-resident.
                pl.BlockSpec((S, H), lambda i: (0, 0)),
                pl.BlockSpec((1, H), lambda i: (0, 0)),
                pl.BlockSpec((H, H), lambda i: (0, 0)),
                pl.BlockSpec((1, H), lambda i: (0, 0)),
                pl.BlockSpec((1, H), lambda i: (0, 0)),
                # Scalar b3 lives in SMEM as a 1-D (1,) ref (no padded tile).
                pl.BlockSpec((1,), lambda i: (0,),
                             memory_space=pltpu.MemorySpace.SMEM),
            ],
            # Lane-dense output: (1, tb) row blocks of a (1, B) array; the ragged last
            # block is masked by Pallas, so no wrapper-side pad/slice at large B.
            out_specs=pl.BlockSpec((1, tb), lambda i: (0, i)),
        ),
        compiler_params=pltpu.CompilerParams(
            dimension_semantics=("parallel",),     # batch axis -> v7x 2-TC split
            vmem_limit_bytes=vmem_limit,
        ),
    )(x, w1m, b1r, w2m, b2r, w3_row, b3s)

    if B_pad != B:
        out = out[:, :B]
    return out.reshape(B, 1)


def init_params(key, state_size, hidden_size):
    k1, k2, k3, k4, k5, k6 = jax.random.split(key, 6)
    # Deterministic synthetic init; shapes mirror nn.Linear(state, hidden) etc.
    # (weights kept as [in, out] so the kernel computes x @ W + b == PyTorch x @ W.T).
    w1 = jax.random.normal(k1, (state_size, hidden_size), jnp.float32) * 0.1
    b1 = jax.random.normal(k2, (hidden_size,), jnp.float32) * 0.1
    w2 = jax.random.normal(k3, (hidden_size, hidden_size), jnp.float32) * 0.1
    b2 = jax.random.normal(k4, (hidden_size,), jnp.float32) * 0.1
    w3 = jax.random.normal(k5, (hidden_size, 1), jnp.float32) * 0.1
    b3 = jax.random.normal(k6, (1,), jnp.float32) * 0.1
    return (w1, b1, w2, b2, w3, b3)


def actor_reference(x, params):
    w1, b1, w2, b2, w3, b3 = params
    h1 = jnp.maximum(x @ w1 + b1.reshape(1, -1), 0.0)
    h2 = jnp.maximum(h1 @ w2 + b2.reshape(1, -1), 0.0)
    return h2 @ w3 + b3.reshape(1, 1)


if __name__ == "__main__":
    state_size, hidden_size = 4, 32
    key = jax.random.PRNGKey(0)
    kx, kx2, kp = jax.random.split(key, 3)
    params = init_params(kp, state_size, hidden_size)

    # Small batch: single grid step (tiny-batch pad path).
    x = jax.random.normal(kx, (8, state_size), jnp.float32)
    out = jax.block_until_ready(actor_forward(x, params))
    ref = actor_reference(x, params)
    assert out.shape == (8, 1)
    assert jnp.allclose(out, ref, atol=1e-5, rtol=1e-5)

    # Non-multiple batch, default (VMEM-derived) tile: multi-step grid + ragged last
    # block handled by Pallas masking (no wrapper pad / slice).
    x2 = jax.random.normal(kx2, (300, state_size), jnp.float32)
    out2 = jax.block_until_ready(actor_forward(x2, params))
    ref2 = actor_reference(x2, params)
    assert out2.shape == (300, 1)
    assert jnp.allclose(out2, ref2, atol=1e-5, rtol=1e-5)

    # Optional bf16-matmul path (weights pre-cast once in the wrapper, f32 accumulate):
    # tolerance is gated looser since it intentionally deviates from the f32 reference.
    out3 = jax.block_until_ready(
        actor_forward(x2, params, tile_b=128, matmul_dtype=jnp.bfloat16))
    assert out3.shape == (300, 1)
    assert jnp.allclose(out3, ref2, atol=5e-2, rtol=5e-2)

    print("KERNEL_OK")
</pallas_src>

<mosaic_0001>
module attributes {stable_mosaic.version = 11 : i64} {
  func.func @_actor_kernel(%arg0: i32, %arg1: memref<128x4xf32, #tpu.memory_space<vmem>>, %arg2: memref<4x32xf32, #tpu.memory_space<vmem>>, %arg3: memref<1x32xf32, #tpu.memory_space<vmem>>, %arg4: memref<32x32xf32, #tpu.memory_space<vmem>>, %arg5: memref<1x32xf32, #tpu.memory_space<vmem>>, %arg6: memref<1x32xf32, #tpu.memory_space<vmem>>, %arg7: memref<1xf32, #tpu.memory_space<smem>>, %arg8: memref<1x128xf32, #tpu.memory_space<vmem>>) attributes {dimension_semantics = [#tpu.dimension_semantics<parallel>], iteration_bounds = array<i64: 1>, scalar_prefetch = 0 : i64, scratch_operands = 0 : i64, tpu.core_type = #tpu.core_type<tc>, window_params = [{transform_indices = @transform_0, window_bounds = array<i64: 128, 4>}, {pipeline_mode = #tpu.pipeline_mode<synchronous>, transform_indices = @transform_1, window_bounds = array<i64: 4, 32>}, {pipeline_mode = #tpu.pipeline_mode<synchronous>, transform_indices = @transform_2, window_bounds = array<i64: 1, 32>}, {pipeline_mode = #tpu.pipeline_mode<synchronous>, transform_indices = @transform_3, window_bounds = array<i64: 32, 32>}, {pipeline_mode = #tpu.pipeline_mode<synchronous>, transform_indices = @transform_4, window_bounds = array<i64: 1, 32>}, {pipeline_mode = #tpu.pipeline_mode<synchronous>, transform_indices = @transform_5, window_bounds = array<i64: 1, 32>}, {transform_indices = @transform_6, window_bounds = array<i64: 1>}, {transform_indices = @transform_7, window_bounds = array<i64: 1, 128>}]} {
    %c0 = arith.constant 0 : index
    %c0_0 = arith.constant 0 : index
    %0 = vector.load %arg1[%c0, %c0_0] : memref<128x4xf32, #tpu.memory_space<vmem>>, vector<128x4xf32>
    %c0_1 = arith.constant 0 : index
    %c0_2 = arith.constant 0 : index
    %1 = vector.load %arg2[%c0_1, %c0_2] : memref<4x32xf32, #tpu.memory_space<vmem>>, vector<4x32xf32>
    %cst = arith.constant dense<0.000000e+00> : vector<128x32xf32>
    %2 = tpu.matmul %0, %1, %cst {dimension_numbers = #tpu.dot_dimension_numbers<[1], [0], [0], [1], [0, 0, 1, 1], [], []>} : vector<128x4xf32>, vector<4x32xf32>, vector<128x32xf32> -> vector<128x32xf32>
    %c0_3 = arith.constant 0 : index
    %c0_4 = arith.constant 0 : index
    %3 = vector.load %arg3[%c0_3, %c0_4] : memref<1x32xf32, #tpu.memory_space<vmem>>, vector<1x32xf32>
    %4 = vector.broadcast %3 : vector<1x32xf32> to vector<128x32xf32>
    %5 = arith.addf %2, %4 : vector<128x32xf32>
    %cst_5 = arith.constant 0.000000e+00 : f32
    %6 = vector.broadcast %cst_5 : f32 to vector<128x32xf32>
    %7 = arith.maximumf %5, %6 : vector<128x32xf32>
    %c0_6 = arith.constant 0 : index
    %c0_7 = arith.constant 0 : index
    %8 = vector.load %arg4[%c0_6, %c0_7] : memref<32x32xf32, #tpu.memory_space<vmem>>, vector<32x32xf32>
    %cst_8 = arith.constant dense<0.000000e+00> : vector<128x32xf32>
    %9 = tpu.matmul %7, %8, %cst_8 {dimension_numbers = #tpu.dot_dimension_numbers<[1], [0], [0], [1], [0, 0, 1, 1], [], []>} : vector<128x32xf32>, vector<32x32xf32>, vector<128x32xf32> -> vector<128x32xf32>
    %c0_9 = arith.constant 0 : index
    %c0_10 = arith.constant 0 : index
    %10 = vector.load %arg5[%c0_9, %c0_10] : memref<1x32xf32, #tpu.memory_space<vmem>>, vector<1x32xf32>
    %11 = vector.broadcast %10 : vector<1x32xf32> to vector<128x32xf32>
    %12 = arith.addf %9, %11 : vector<128x32xf32>
    %cst_11 = arith.constant 0.000000e+00 : f32
    %13 = vector.broadcast %cst_11 : f32 to vector<128x32xf32>
    %14 = arith.maximumf %12, %13 : vector<128x32xf32>
    %c0_12 = arith.constant 0 : index
    %c0_13 = arith.constant 0 : index
    %15 = vector.load %arg6[%c0_12, %c0_13] : memref<1x32xf32, #tpu.memory_space<vmem>>, vector<1x32xf32>
    %cst_14 = arith.constant dense<0.000000e+00> : vector<1x128xf32>
    %16 = tpu.matmul %15, %14, %cst_14 {dimension_numbers = #tpu.dot_dimension_numbers<[1], [1], [0], [0], [0, 0, 1, 0], [], []>} : vector<1x32xf32>, vector<128x32xf32>, vector<1x128xf32> -> vector<1x128xf32>
    %c0_15 = arith.constant 0 : index
    %17 = memref.load %arg7[%c0_15] : memref<1xf32, #tpu.memory_space<smem>>
    %18 = vector.broadcast %17 : f32 to vector<1x128xf32>
    %19 = arith.addf %16, %18 : vector<1x128xf32>
    %c0_16 = arith.constant 0 : index
    %c0_17 = arith.constant 0 : index
    %20 = vector.load %arg8[%c0_16, %c0_17] : memref<1x128xf32, #tpu.memory_space<vmem>>, vector<1x128xf32>
    tpu.vector_store %arg8[%c0_16, %c0_17], %19 {strides = array<i32>} : memref<1x128xf32, #tpu.memory_space<vmem>>, vector<1x128xf32>,
    return
  }
  func.func @transform_0(%arg0: i32) -> (i32, i32) {
    %c0_i32 = arith.constant 0 : i32
    %c0_i32_0 = arith.constant 0 : i32
    return %arg0, %c0_i32 : i32, i32
  }
  func.func @transform_1(%arg0: i32) -> (i32, i32) {
    %c0_i32 = arith.constant 0 : i32
    %c0_i32_0 = arith.constant 0 : i32
    %c0_i32_1 = arith.constant 0 : i32
    return %c0_i32, %c0_i32_0 : i32, i32
  }
  func.func @transform_2(%arg0: i32) -> (i32, i32) {
    %c0_i32 = arith.constant 0 : i32
    %c0_i32_0 = arith.constant 0 : i32
    %c0_i32_1 = arith.constant 0 : i32
    return %c0_i32, %c0_i32_0 : i32, i32
  }
  func.func @transform_3(%arg0: i32) -> (i32, i32) {
    %c0_i32 = arith.constant 0 : i32
    %c0_i32_0 = arith.constant 0 : i32
    %c0_i32_1 = arith.constant 0 : i32
    return %c0_i32, %c0_i32_0 : i32, i32
  }
  func.func @transform_4(%arg0: i32) -> (i32, i32) {
    %c0_i32 = arith.constant 0 : i32
    %c0_i32_0 = arith.constant 0 : i32
    %c0_i32_1 = arith.constant 0 : i32
    return %c0_i32, %c0_i32_0 : i32, i32
  }
  func.func @transform_5(%arg0: i32) -> (i32, i32) {
    %c0_i32 = arith.constant 0 : i32
    %c0_i32_0 = arith.constant 0 : i32
    %c0_i32_1 = arith.constant 0 : i32
    return %c0_i32, %c0_i32_0 : i32, i32
  }
  func.func @transform_6(%arg0: i32) -> i32 {
    %c0_i32 = arith.constant 0 : i32
    %c0_i32_0 = arith.constant 0 : i32
    return %c0_i32 : i32
  }
  func.func @transform_7(%arg0: i32) -> (i32, i32) {
    %c0_i32 = arith.constant 0 : i32
    %c0_i32_0 = arith.constant 0 : i32
    return %c0_i32, %arg0 : i32, i32
  }
}

</mosaic_0001>

<bundles_post_ra>
// kernel: tpu_custom_call.1
= control target key start
LH: loop header
LB: loop body
LE: loop exit
PB: predicated region body
PF: predicated region fallthrough
CT: control target
= control target key end

     0   :  { %vm101_vm0 = vcmask 1043456   ;;  %vm52_vm1 = vcmask 31744   ;;  %s1087_s0 = inlined_call_operand.vmem [shape: f32[128,4], index: 0, kind: input, shape index: {}]   ;;  %s1088_s1 = inlined_call_operand.vmem [shape: f32[4,32], index: 1, kind: input, shape index: {}]   ;;  %s1089_s2 = inlined_call_operand.vmem [shape: f32[1,32], index: 2, kind: input, shape index: {}]   ;;  %s1090_s3 = inlined_call_operand.vmem [shape: f32[32,32], index: 3, kind: input, shape index: {}]   ;;  %s1091_s4 = inlined_call_operand.vmem [shape: f32[1,32], index: 4, kind: input, shape index: {}]   ;;  %s1092_s5 = inlined_call_operand.vmem [shape: f32[1,32], index: 5, kind: input, shape index: {}]   ;;  %s1093_s6 = inlined_call_operand.<no memory space> [shape: f32[1], index: 6, kind: input, shape index: {}]   ;;  %s1094_s7 = inlined_call_operand.hbm [shape: f32[1,128], index: 7, kind: output, shape index: {}]  }
   0x1   :  { %v44_v0 = vld [vmem:[%s1088_s1] sm:$0xf]  ;;  %v29_v2 = vld [vmem:[%s1087_s0 + $0x8] sm:$0xff]  ;;  %v30_v3 = vld [vmem:[%s1087_s0 + $0x10] sm:$0xff] }
   0x2   :  { %v28_v1 = vld [vmem:[%s1087_s0] sm:$0xff]  ;;  %732 = vmatprep.subr.msk.mxu1 %vm101_vm0, %v44_v0  ;;  %v31_v4 = vld [vmem:[%s1087_s0 + $0x18] sm:$0xff]  ;;  %v267_v7 = vld [vmem:[%s1090_s3 + $0x8] sm:$0xff] }
   0x3   :  { %734 = vmatprep.mubr.msk.f32.mxu1 %vm52_vm1, %v28_v1  ;;  %733 = vmatpush3.msk.msra.mxu1 %vm101_vm0, %v44_v0  ;;  %v32_v5 = vld [vmem:[%s1087_s0 + $0x20] sm:$0xff]  ;;  %v268_v8 = vld [vmem:[%s1090_s3 + $0x10] sm:$0xff]  ;;  %v269_v9 = vld [vmem:[%s1090_s3 + $0x18] sm:$0xff] }
   0x4   :  { %735 = vmatmul.mubr.msk.f32.vlgmr.msra.gmra.mrb[0].mxu1 %vm52_vm1, %v29_v2  ;;  %v266_v6 = vld [vmem:[%s1090_s3] sm:$0xff]  ;;  %v829_v11 = vpack.c.bf16 %v269_v9, %v268_v8 }
   0x5   :  { %737 = vmatprep.mubr.msk.f32.mxu1 %vm52_vm1, %v30_v3  ;;  %v825_v10 = vpack.c.bf16 %v267_v7, %v266_v6 }
   0x8   :  { %738 = vmatmul.mubr.msk.f32.gmra.mrb[2].mxu1 %vm52_vm1, %v31_v4 }
   0x9   :  { %13 = vsyncpa [#allocation4], 0  ;;  %740 = vmatprep.mubr.msk.f32.mxu1 %vm52_vm1, %v32_v5  ;;  %v33_v12 = vld [vmem:[%s1087_s0 + $0x28] sm:$0xff]  ;;  %v34_v13 = vld [vmem:[%s1087_s0 + $0x30] sm:$0xff]  ;;  %826 = vmatprep.subr.bf16.mxu1 %v825_v10  ;;  %vm277_vm2 = vcmask 261120   ;;  %v893_v8 = vmov 0.0|0.0  }
   0xa   :  { %828 = vmatpush3.bf16.msra.mxu1 %v825_v10  ;;  %v35_v14 = vld [vmem:[%s1087_s0 + $0x38] sm:$0xff]  ;;  %v36_v15 = vld [vmem:[%s1087_s0 + $0x40] sm:$0xff]  ;;  %v37_v16 = vld [vmem:[%s1087_s0 + $0x48] sm:$0xff]  ;;  %833 = vmatprep.subr.bf16.mxu0 %v893_v8  ;;  %vm894_vm3 = vmmov 0   ;;  %v895_v9 = vmov 0.0   ;;  %s896_s22 = smov [#allocation3]  }
   0xb   :  { %830 = vmatprep.subr.bf16.mxu1 %v829_v11  ;;  %v38_v17 = vld [vmem:[%s1087_s0 + $0x50] sm:$0xff]  ;;  %v39_v18 = vld [vmem:[%s1087_s0 + $0x58] sm:$0xff]  ;;  %v40_v19 = vld [vmem:[%s1087_s0 + $0x60] sm:$0xff]  ;;  %822 = vmatprep.mubr.msk.f32.mxu0 %vm894_vm3, %v895_v9  ;;  %s618_s23 = sshll.u32 %s896_s22, 4  ;;  %s619_s23 = int_to_ptr.vmem [resolvable:$true] %s618_s23 }
   0xc   :  { %741 = vmatmul.mubr.msk.f32.gmra.mrb[4].mxu1 %vm52_vm1, %v33_v12  ;;  %v41_v20 = vld [vmem:[%s1087_s0 + $0x68] sm:$0xff]  ;;  %v42_v21 = vld [vmem:[%s1087_s0 + $0x70] sm:$0xff]  ;;  %v43_v22 = vld [vmem:[%s1087_s0 + $0x78] sm:$0xff]  ;;  %s869_s3 = scalar_lea.vmem %s619_s23, 16  ;;  %s873_s24 = scalar_lea.vmem %s619_s23, 32 }
   0xd   :  { %743 = vmatprep.mubr.msk.f32.mxu1 %vm52_vm1, %v34_v13  ;;  %v626_v23 = vld [vmem:[%s1089_s2] ss:$0 sm:$0xff]  ;;  %vm1041_vm4 = vmpackc.low %vm277_vm2, %vm277_vm2  ;;  %p870_p0 = scmp.ne.s32.totalorder %s619_s23, %s869_s3  ;;  %p874_p1 = scmp.lt.s32.totalorder %s619_s23, %s619_s23 }
   0xe   :  { %832 = vmatpush3.bf16.msra.mxu1 %v829_v11  ;;  %v644_v10 = vld [vmem:[%s1091_s4] ss:$0 sm:$0xff]  ;;  %p875_p2 = scmp.lt.s32.totalorder %s873_s24, %s869_s3 }
  0x10   :  { %744 = vmatmul.mubr.msk.f32.gmra.mrb[6].mxu1 %vm52_vm1, %v35_v14  ;;  %p876_p3 = por %p875_p2, %p874_p1 }
  0x11   :  { %746 = vmatprep.mubr.msk.f32.mxu1 %vm52_vm1, %v36_v15 }
  0x12   :  { %p877_p4 = pnand %p876_p3, %p870_p0 }
  0x14   :  { %747 = vmatmul.mubr.msk.f32.gmra.mrb[8].mxu1 %vm52_vm1, %v37_v16 }
  0x15   :  { %749 = vmatprep.mubr.msk.f32.mxu1 %vm52_vm1, %v38_v17 }
  0x18   :  { %750 = vmatmul.mubr.msk.f32.gmra.mrb[10].mxu1 %vm52_vm1, %v39_v18 }
  0x19   :  { %752 = vmatprep.mubr.msk.f32.mxu1 %vm52_vm1, %v40_v19 }
  0x1c   :  { %753 = vmatmul.mubr.msk.f32.gmra.mrb[12].mxu1 %vm52_vm1, %v41_v20 }
  0x1d   :  { %755 = vmatprep.mubr.msk.f32.mxu1 %vm52_vm1, %v42_v21 }
  0x20   :  { %756 = vmatmul.mubr.msk.f32.gmra.mrb[14].mxu1 %vm52_vm1, %v43_v22 }
  0xd7   :  { %v736_v24 = vpop.f32.mrb[0].mxu1 }
  0xd8   :  { %v177_v25 = vadd.f32 %v736_v24, %v626_v23  ;;  %v171_v26 = vpop.f32.mrb[1].mxu1 }
  0xd9   :  { %v172_v27 = vadd.f32 %v626_v23, %v171_v26 }
  0xda   :  { %v251_v30 = vmax.f32 %v177_v25, 0.0 }
  0xdb   :  { %v250_v28 = vmax.f32 %v172_v27, 0.0  ;;  %v739_v29 = vpop.f32.mrb[2].mxu1 }
  0xdc   :  { %v187_v31 = vadd.f32 %v739_v29, %v626_v23  ;;  %v181_v32 = vpop.f32.mrb[3].mxu1 }
  0xdd   :  { %v182_v33 = vadd.f32 %v626_v23, %v181_v32  ;;  %766 = vmatprep.mubr.msk.f32.mxu1 %vm277_vm2, %v250_v28 }
  0xde   :  { %v253_v34 = vmax.f32 %v187_v31, 0.0  ;;  %767 = vmatmul.mubr.msk.f32.vlgmr.msra.gmra.mrb[16].mxu1 %vm277_vm2, %v251_v30 }
  0xdf   :  { %v252_v35 = vmax.f32 %v182_v33, 0.0  ;;  %v742_v36 = vpop.f32.mrb[4].mxu1 }
  0xe0   :  { %v197_v37 = vadd.f32 %v742_v36, %v626_v23  ;;  %v191_v38 = vpop.f32.mrb[5].mxu1 }
  0xe1   :  { %769 = vmatprep.mubr.msk.f32.mxu1 %vm277_vm2, %v252_v35  ;;  %v192_v39 = vadd.f32 %v626_v23, %v191_v38 }
  0xe2   :  { %770 = vmatmul.mubr.msk.f32.gmra.mrb[18].mxu1 %vm277_vm2, %v253_v34  ;;  %v255_v40 = vmax.f32 %v197_v37, 0.0 }
  0xe3   :  { %v254_v41 = vmax.f32 %v192_v39, 0.0  ;;  %v745_v42 = vpop.f32.mrb[6].mxu1 }
  0xe4   :  { %v207_v43 = vadd.f32 %v745_v42, %v626_v23  ;;  %v201_v44 = vpop.f32.mrb[7].mxu1 }
  0xe5   :  { %772 = vmatprep.mubr.msk.f32.mxu1 %vm277_vm2, %v254_v41  ;;  %v202_v45 = vadd.f32 %v626_v23, %v201_v44 }
  0xe6   :  { %773 = vmatmul.mubr.msk.f32.gmra.mrb[20].mxu1 %vm277_vm2, %v255_v40  ;;  %v257_v46 = vmax.f32 %v207_v43, 0.0 }
  0xe7   :  { %v256_v47 = vmax.f32 %v202_v45, 0.0  ;;  %v748_v48 = vpop.f32.mrb[8].mxu1 }
  0xe8   :  { %v217_v49 = vadd.f32 %v748_v48, %v626_v23  ;;  %v211_v50 = vpop.f32.mrb[9].mxu1 }
  0xe9   :  { %775 = vmatprep.mubr.msk.f32.mxu1 %vm277_vm2, %v256_v47  ;;  %v212_v51 = vadd.f32 %v626_v23, %v211_v50 }
  0xea   :  { %776 = vmatmul.mubr.msk.f32.gmra.mrb[22].mxu1 %vm277_vm2, %v257_v46  ;;  %v259_v52 = vmax.f32 %v217_v49, 0.0 }
  0xeb   :  { %v258_v53 = vmax.f32 %v212_v51, 0.0  ;;  %v751_v54 = vpop.f32.mrb[10].mxu1 }
  0xec   :  { %v227_v55 = vadd.f32 %v751_v54, %v626_v23  ;;  %v221_v56 = vpop.f32.mrb[11].mxu1 }
  0xed   :  { %778 = vmatprep.mubr.msk.f32.mxu1 %vm277_vm2, %v258_v53  ;;  %v222_v57 = vadd.f32 %v626_v23, %v221_v56 }
  0xee   :  { %779 = vmatmul.mubr.msk.f32.gmra.mrb[24].mxu1 %vm277_vm2, %v259_v52  ;;  %v261_v58 = vmax.f32 %v227_v55, 0.0 }
  0xef   :  { %v260_v59 = vmax.f32 %v222_v57, 0.0  ;;  %v754_v60 = vpop.f32.mrb[12].mxu1 }
  0xf0   :  { %v237_v61 = vadd.f32 %v754_v60, %v626_v23  ;;  %v231_v62 = vpop.f32.mrb[13].mxu1 }
  0xf1   :  { %781 = vmatprep.mubr.msk.f32.mxu1 %vm277_vm2, %v260_v59  ;;  %v232_v63 = vadd.f32 %v626_v23, %v231_v62 }
  0xf2   :  { %782 = vmatmul.mubr.msk.f32.gmra.mrb[26].mxu1 %vm277_vm2, %v261_v58  ;;  %v263_v0 = vmax.f32 %v237_v61, 0.0 }
  0xf3   :  { %v262_v1 = vmax.f32 %v232_v63, 0.0  ;;  %v757_v2 = vpop.f32.mrb[14].mxu1 }
  0xf4   :  { %v247_v3 = vadd.f32 %v757_v2, %v626_v23  ;;  %v241_v4 = vpop.f32.mrb[15].mxu1 }
  0xf5   :  { %784 = vmatprep.mubr.msk.f32.mxu1 %vm277_vm2, %v262_v1  ;;  %v242_v5 = vadd.f32 %v626_v23, %v241_v4  ;;  %v487_v4 = vld [vmem:[%s1092_s5] sm:$0x1] }
  0xf6   :  { %785 = vmatmul.mubr.msk.f32.gmra.mrb[28].mxu1 %vm277_vm2, %v263_v0  ;;  %v265_v6 = vmax.f32 %v247_v3, 0.0 }
  0xf7   :  { %v264_v7 = vmax.f32 %v242_v5, 0.0  ;;  %v489_v5 = vstv %s1093_s6 }
  0xf9   :  { %787 = vmatprep.mubr.msk.f32.mxu1 %vm277_vm2, %v264_v7 }
  0xfa   :  { %788 = vmatmul.mubr.msk.f32.gmra.mrb[30].mxu1 %vm277_vm2, %v265_v6 }
 0x1b1   :  { %v768_v11 = vpop.f32.mrb[16].mxu1 }
 0x1b2   :  { %v398_v12 = vadd.f32 %v768_v11, %v644_v10  ;;  %v392_v13 = vpop.f32.mrb[17].mxu1 }
 0x1b3   :  { %v393_v14 = vadd.f32 %v644_v10, %v392_v13 }
 0x1b4   :  { %v472_v15 = vmax.f32 %v398_v12, 0.0 }
 0x1b5   :  { %v471_v16 = vmax.f32 %v393_v14, 0.0  ;;  %v771_v17 = vpop.f32.mrb[18].mxu1 }
 0x1b6   :  { %v408_v18 = vadd.f32 %v771_v17, %v644_v10  ;;  %v402_v19 = vpop.f32.mrb[19].mxu1 }
 0x1b7   :  { %v834_v21 = vpack.c.bf16 %v472_v15, %v471_v16  ;;  %v403_v22 = vadd.f32 %v644_v10, %v402_v19 }
 0x1b8   :  { %v474_v23 = vmax.f32 %v408_v18, 0.0 }
 0x1b9   :  { %v473_v24 = vmax.f32 %v403_v22, 0.0  ;;  %836 = vmatpush3.bf16.xpose.msk.msra.mxu0 %vm1041_vm4, %v834_v21  ;;  %v774_v25 = vpop.f32.mrb[20].mxu1 }
 0x1ba   :  { %v418_v26 = vadd.f32 %v774_v25, %v644_v10  ;;  %v412_v27 = vpop.f32.mrb[21].mxu1  ;;  %837 = vmatprep.subr.bf16.mxu0 %v893_v8 }
 0x1bb   :  { %v838_v28 = vpack.c.bf16 %v474_v23, %v473_v24  ;;  %v413_v29 = vadd.f32 %v644_v10, %v412_v27 }
 0x1bc   :  { %v476_v30 = vmax.f32 %v418_v26, 0.0 }
 0x1bd   :  { %v475_v31 = vmax.f32 %v413_v29, 0.0  ;;  %v777_v32 = vpop.f32.mrb[22].mxu1 }
 0x1be   :  { %v428_v33 = vadd.f32 %v777_v32, %v644_v10  ;;  %v422_v34 = vpop.f32.mrb[23].mxu1 }
 0x1bf   :  { %v842_v35 = vpack.c.bf16 %v476_v30, %v475_v31  ;;  %v423_v36 = vadd.f32 %v644_v10, %v422_v34 }
 0x1c0   :  { %v478_v37 = vmax.f32 %v428_v33, 0.0 }
 0x1c1   :  { %840 = vmatpush3.bf16.xpose.msk.msra.mxu0 %vm1041_vm4, %v838_v28  ;;  %v477_v38 = vmax.f32 %v423_v36, 0.0  ;;  %v780_v39 = vpop.f32.mrb[24].mxu1 }
 0x1c2   :  { %841 = vmatprep.subr.bf16.mxu0 %v893_v8  ;;  %v438_v40 = vadd.f32 %v780_v39, %v644_v10  ;;  %v432_v41 = vpop.f32.mrb[25].mxu1 }
 0x1c3   :  { %v846_v42 = vpack.c.bf16 %v478_v37, %v477_v38  ;;  %v433_v43 = vadd.f32 %v644_v10, %v432_v41 }
 0x1c4   :  { %v480_v44 = vmax.f32 %v438_v40, 0.0 }
 0x1c5   :  { %v479_v45 = vmax.f32 %v433_v43, 0.0  ;;  %v783_v46 = vpop.f32.mrb[26].mxu1 }
 0x1c6   :  { %v448_v47 = vadd.f32 %v783_v46, %v644_v10  ;;  %v442_v48 = vpop.f32.mrb[27].mxu1 }
 0x1c7   :  { %v850_v49 = vpack.c.bf16 %v480_v44, %v479_v45  ;;  %v443_v50 = vadd.f32 %v644_v10, %v442_v48 }
 0x1c8   :  { %v482_v51 = vmax.f32 %v448_v47, 0.0 }
 0x1c9   :  { %844 = vmatpush3.bf16.xpose.msk.msra.mxu0 %vm1041_vm4, %v842_v35  ;;  %v481_v52 = vmax.f32 %v443_v50, 0.0  ;;  %v786_v53 = vpop.f32.mrb[28].mxu1 }
 0x1ca   :  { %845 = vmatprep.subr.bf16.mxu0 %v893_v8  ;;  %v458_v54 = vadd.f32 %v786_v53, %v644_v10  ;;  %v452_v55 = vpop.f32.mrb[29].mxu1 }
 0x1cb   :  { %v854_v56 = vpack.c.bf16 %v482_v51, %v481_v52  ;;  %v453_v57 = vadd.f32 %v644_v10, %v452_v55 }
 0x1cc   :  { %v484_v58 = vmax.f32 %v458_v54, 0.0 }
 0x1cd   :  { %v483_v59 = vmax.f32 %v453_v57, 0.0  ;;  %v789_v60 = vpop.f32.mrb[30].mxu1 }
 0x1ce   :  { %v468_v61 = vadd.f32 %v789_v60, %v644_v10  ;;  %v462_v62 = vpop.f32.mrb[31].mxu1 }
 0x1cf   :  { %v858_v63 = vpack.c.bf16 %v484_v58, %v483_v59  ;;  %v463_v0 = vadd.f32 %v644_v10, %v462_v62 }
 0x1d0   :  { %v486_v1 = vmax.f32 %v468_v61, 0.0 }
 0x1d1   :  { %848 = vmatpush3.bf16.xpose.msk.msra.mxu0 %vm1041_vm4, %v846_v42  ;;  %v485_v2 = vmax.f32 %v463_v0, 0.0 }
 0x1d2   :  { %849 = vmatprep.subr.bf16.mxu0 %v893_v8 }
 0x1d3   :  { %v862_v3 = vpack.c.bf16 %v486_v1, %v485_v2 }
 0x1d9   :  { %852 = vmatpush3.bf16.xpose.msk.msra.mxu0 %vm1041_vm4, %v850_v49 }
 0x1da   :  { %853 = vmatprep.subr.bf16.mxu0 %v893_v8 }
 0x1e1   :  { %856 = vmatpush3.bf16.xpose.msk.msra.mxu0 %vm1041_vm4, %v854_v56 }
 0x1e2   :  { %857 = vmatprep.subr.bf16.mxu0 %v893_v8 }
 0x1e9   :  { %860 = vmatpush3.bf16.xpose.msk.msra.mxu0 %vm1041_vm4, %v858_v63 }
 0x1ea   :  { %861 = vmatprep.subr.bf16.mxu0 %v893_v8 }
 0x1f1   :  { %864 = vmatpush3.bf16.xpose.msk.msra.mxu0 %vm1041_vm4, %v862_v3 }
 0x1f8   :  { %823 = vmatmul.mubr.msk.f32.vlgmr.msra.gmra.mrb[0].mxu0 %vm277_vm2, %v487_v4 }
 0x2cb   :  { %v607_v6 = vpop.f32.mrb[0].mxu0 }
 0x2cc   :  { %v608_v7 = vadd.f32 %v607_v6, %v489_v5  ;;  %v824_v9 = vpop.f32.mrb[1].mxu0 }
 0x2ce   :  { %611 = vst [vmem:[#allocation3] sm:$0x1] %v608_v7 }
 0x2cf   :  { %880 = shalt.err (!%p877_p4)
}
 0x2d0   :  { %s881_s26 = scalar_lea.hbm %s1094_s7, 16 }
 0x2d1   :  { %p882_p5 = scmp.ne.s32.totalorder %s1094_s7, %s881_s26  ;;  %p885_p6 = scmp.lt.u32.totalorder %s881_s26, %s1094_s7 }
 0x2d3   :  { %p887_p7 = pnand %p885_p6, %p882_p5 }
 0x2d5   :  { %890 = shalt.err (!%p887_p7)
}
 0x2d6   :  { %621 = dma.vmem_to_hbm [thread:$0]  %s619_s23, 16, %s1094_s7, [#allocation4]  }
 0x2d7   :  { %891 = dma.done.wait [#allocation4], 16  }
 0x2d8   :  { %892 = vsyncadd [#allocation4], 4294967280 }
 0x2d9   :  { %625 = vsyncpa [#allocation4], 1 }

</bundles_post_ra>
